<compile_context>
chip_gen: v7x
topology: tpu7x:2x2x1
jax: 0.10.0
libtpu: 0.0.40
codegen_flags: <defaults>
</compile_context>

<pallas_src>
import functools

import jax
import jax.numpy as jnp
from jax.experimental import pallas as pl
from jax.experimental.pallas import tpu as pltpu


# ------------------------------ Pallas kernel --------------------------------
def _odconv_kernel(kernel_att_ref,   # SMEM (B, kernel_num)              f32
                   col_scale_ref,    # VMEM (1, K*K*Cin)                 f32
                   filter_att_ref,   # VMEM (Cout, 1)                    f32
                   patches_ref,      # VMEM (K*K*Cin, TP)                bf16
                   w_ref,            # VMEM (kernel_num, Cout, K*K*Cin)  bf16
                   out_ref):         # VMEM (Cout, TP)                   f32
    b = pl.program_id(0)
    kn = w_ref.shape[0]

    # Aggregate candidate kernels over kernel_num (short static loop, f32 VPU
    # math -- safe on v5e which has no bf16 VPU; scalars come from SMEM).
    w_agg = w_ref[0].astype(jnp.float32) * kernel_att_ref[b, 0]
    for n in range(1, kn):
        w_agg = w_agg + w_ref[n].astype(jnp.float32) * kernel_att_ref[b, n]

    # Fold spatial*channel attention into the contraction columns (lane
    # broadcast) and filter attention into the output rows (sublane broadcast),
    # so there is no per-(Cout, P) epilogue pass after the matmul.
    w_agg = w_agg * col_scale_ref[...] * filter_att_ref[...]

    # Single deep MXU matmul: (Cout, K*K*Cin) @ (K*K*Cin, TP), bf16 in, f32 acc.
    out_ref[...] = jnp.dot(w_agg.astype(jnp.bfloat16), patches_ref[...],
                           preferred_element_type=jnp.float32)


# ------------------------------- JAX glue -------------------------------------
def _round_up(x, m):
    return (x + m - 1) // m * m


def init_params(key, C, Cout, K, kernel_num, r):
    inter = C // r
    ks = jax.random.split(key, 10)
    return {
        'weight':   jax.random.uniform(ks[0], (kernel_num, Cout, C, K, K), jnp.float32),
        'fc_w':     0.3 * jax.random.normal(ks[1], (inter, C), jnp.float32),
        'bn_gamma': jnp.ones((inter,), jnp.float32),
        'bn_beta':  jnp.zeros((inter,), jnp.float32),
        'ch_w':     0.3 * jax.random.normal(ks[2], (C, inter), jnp.float32),
        'ch_b':     0.1 * jax.random.normal(ks[3], (C,), jnp.float32),
        'fi_w':     0.3 * jax.random.normal(ks[4], (Cout, inter), jnp.float32),
        'fi_b':     0.1 * jax.random.normal(ks[5], (Cout,), jnp.float32),
        'sp_w':     0.3 * jax.random.normal(ks[6], (K * K, inter), jnp.float32),
        'sp_b':     0.1 * jax.random.normal(ks[7], (K * K,), jnp.float32),
        'kn_w':     0.3 * jax.random.normal(ks[8], (kernel_num, inter), jnp.float32),
        'kn_b':     0.1 * jax.random.normal(ks[9], (kernel_num,), jnp.float32),
    }


def get_attention(x, p, temperature=1.0):
    # GAP -> 1x1 conv (no bias) -> BatchNorm2d (training-mode batch stats,
    # spatial size is 1x1) -> ReLU -> four 1x1-conv attention heads.
    g = jnp.mean(x, axis=(2, 3))                           # (B, C)
    h = g @ p['fc_w'].T                                    # (B, inter)
    mu = jnp.mean(h, axis=0, keepdims=True)
    var = jnp.mean((h - mu) ** 2, axis=0, keepdims=True)
    h = (h - mu) * jax.lax.rsqrt(var + 1e-5) * p['bn_gamma'] + p['bn_beta']
    h = jnp.maximum(h, 0.0)
    channel_att = jax.nn.sigmoid((h @ p['ch_w'].T + p['ch_b']) / temperature)  # (B, C)
    filter_att  = jax.nn.sigmoid((h @ p['fi_w'].T + p['fi_b']) / temperature)  # (B, Cout)
    spatial_att = jax.nn.sigmoid((h @ p['sp_w'].T + p['sp_b']) / temperature)  # (B, K*K)
    kernel_att  = jax.nn.softmax((h @ p['kn_w'].T + p['kn_b']) / temperature, axis=1)
    return channel_att, filter_att, spatial_att, kernel_att


def extract_patches(x, K, stride, padding, dilation):
    # im2col (pure data movement / glue); kk = ki*K + kj, p = i*Wout + j.
    B, C, H, W = x.shape
    xp = jnp.pad(x, ((0, 0), (0, 0), (padding, padding), (padding, padding)))
    Hp, Wp = H + 2 * padding, W + 2 * padding
    Hout = (Hp - dilation * (K - 1) - 1) // stride + 1
    Wout = (Wp - dilation * (K - 1) - 1) // stride + 1
    slabs = []
    for ki in range(K):
        for kj in range(K):
            s = xp[:, :,
                   ki * dilation: ki * dilation + (Hout - 1) * stride + 1: stride,
                   kj * dilation: kj * dilation + (Wout - 1) * stride + 1: stride]
            slabs.append(s.reshape(B, C, Hout * Wout))
    return jnp.stack(slabs, axis=1), Hout, Wout            # (B, K*K, C, P)


def odconv_forward(x, params, *, kernel_size, kernel_num, stride=1, padding=0,
                   dilation=1, groups=1, temperature=1.0):
    # TODO(synk): grouped conv (groups > 1) not implemented in the kernel.
    assert groups == 1
    B, C, H, W = x.shape
    Cout = params['weight'].shape[1]
    K, KK = kernel_size, kernel_size * kernel_size
    KKC = KK * C

    channel_att, filter_att, spatial_att, kernel_att = get_attention(
        x, params, temperature)
    patches, Hout, Wout = extract_patches(x, K, stride, padding, dilation)
    P = Hout * Wout

    # Lane-aligned P padding and P tiling (lane-dense stores, megacore fodder).
    TP = min(512, _round_up(P, 128))
    P_pad = _round_up(P, TP)
    NPT = P_pad // TP

    # im2col patches flattened onto the contraction dim, bf16 in HBM
    # (halves HBM->VMEM DMA bytes of the largest operand).
    patches = patches.reshape(B, KKC, P)
    patches = jnp.pad(patches, ((0, 0), (0, 0), (0, P_pad - P)))
    patches = patches.astype(jnp.bfloat16)

    # Candidate kernels re-laid out to (kernel_num, Cout, K*K*Cin), bf16 in HBM.
    # Contraction index = kk*Cin + cin, matching the patch layout above.
    w_r = jnp.transpose(params['weight'], (0, 1, 3, 4, 2)).reshape(
        kernel_num, Cout, KKC).astype(jnp.bfloat16)

    # Spatial (per-kk) and channel (per-Cin) attentions combine into a single
    # per-contraction-column scale; filter attention scales output rows.
    col_scale = (spatial_att[:, :, None] * channel_att[:, None, :]
                 ).reshape(B, 1, KKC)                       # (B, 1, K*K*Cin) f32
    fa3 = filter_att[:, :, None]                            # (B, Cout, 1)    f32

    out = pl.pallas_call(
        _odconv_kernel,
        out_shape=jax.ShapeDtypeStruct((B, Cout, P_pad), jnp.float32),
        grid_spec=pltpu.PrefetchScalarGridSpec(
            num_scalar_prefetch=0,
            grid=(B, NPT),
            in_specs=[
                # Per-batch kernel-attention scalars live resident in SMEM.
                pl.BlockSpec(memory_space=pltpu.MemorySpace.SMEM),
                # Per-batch attention vectors: block index changes only when b
                # changes, so these tiny blocks are DMA'd B times, not B*NPT.
                pl.BlockSpec((pl.Squeezed(), 1, KKC), lambda b, pt: (b, 0, 0)),
                pl.BlockSpec((pl.Squeezed(), Cout, 1), lambda b, pt: (b, 0, 0)),
                # Activation patches: (K*K*Cin, TP) tile per (b, pt).
                pl.BlockSpec((pl.Squeezed(), KKC, TP), lambda b, pt: (b, 0, pt)),
                # Full candidate-kernel block; constant index -> fetched once.
                # TODO(synk): at production channel counts add
                #             pipeline_mode=pl.Buffered(1) and tile over Cout
                #             to fit v7x's 64 MiB VMEM.
                pl.BlockSpec((kernel_num, Cout, KKC), lambda b, pt: (0, 0, 0)),
            ],
            out_specs=pl.BlockSpec((pl.Squeezed(), Cout, TP),
                                   lambda b, pt: (b, 0, pt)),
        ),
        compiler_params=pltpu.CompilerParams(
            dimension_semantics=("parallel", "parallel")),
    )(kernel_att, col_scale, fa3, patches, w_r)

    return out[:, :, :P].reshape(B, Cout, Hout, Wout)


# ---------------------------- pure-JAX reference ------------------------------
def odconv_ref(x, params, *, kernel_size, kernel_num, stride=1, padding=0,
               dilation=1, temperature=1.0):
    B, C, H, W = x.shape
    K = kernel_size
    weight = params['weight']                                 # (n, Cout, Cin, K, K)
    ca, fa, sa, ka = get_attention(x, params, temperature)
    x_m = x * ca[:, :, None, None]
    w = (sa.reshape(B, 1, 1, 1, K, K) * ka.reshape(B, kernel_num, 1, 1, 1, 1)
         * weight[None]).sum(axis=1)                          # (B, Cout, Cin, K, K)
    ys = []
    for b in range(B):
        ys.append(jax.lax.conv_general_dilated(
            x_m[b:b + 1], w[b], window_strides=(stride, stride),
            padding=[(padding, padding), (padding, padding)],
            rhs_dilation=(dilation, dilation),
            dimension_numbers=('NCHW', 'OIHW', 'NCHW'),
            precision=jax.lax.Precision.HIGHEST))
    y = jnp.concatenate(ys, axis=0)
    return y * fa[:, :, None, None]


# ------------------------------------ main ------------------------------------
if __name__ == "__main__":
    B, C, H, W = 2, 16, 16, 16
    Cout, K, KN, r = 16, 3, 4, 4          # r=4 so inter_channels = C // r = 4 > 0

    key = jax.random.PRNGKey(0)
    kx, kp = jax.random.split(key)
    x = jax.random.normal(kx, (B, C, H, W), jnp.float32)
    params = init_params(kp, C, Cout, K, KN, r)

    fwd = jax.jit(functools.partial(odconv_forward, kernel_size=K, kernel_num=KN,
                                    stride=1, padding=0, dilation=1, groups=1))
    y = fwd(x, params)
    jax.block_until_ready(y)

    y_ref = odconv_ref(x, params, kernel_size=K, kernel_num=KN,
                       stride=1, padding=0, dilation=1)
    assert y.shape == y_ref.shape, (y.shape, y_ref.shape)
    err = float(jnp.max(jnp.abs(y - y_ref)))
    ref_mag = float(jnp.max(jnp.abs(y_ref)))
    # bf16 MXU inputs (f32 accumulation): allow a few percent relative error
    # vs. the f32-HIGHEST reference.
    assert err <= 5e-2 * ref_mag + 1e-4, f"max abs err {err} (ref magnitude {ref_mag})"
    print("KERNEL_OK")
</pallas_src>

<mosaic_0001>
module attributes {stable_mosaic.version = 11 : i64} {
  func.func @_odconv_kernel(%arg0: i32, %arg1: i32, %arg2: memref<2x4xf32, #tpu.memory_space<smem>>, %arg3: memref<1x1x144xf32, #tpu.memory_space<vmem>>, %arg4: memref<1x16x1xf32, #tpu.memory_space<vmem>>, %arg5: memref<1x144x256xbf16, #tpu.memory_space<vmem>>, %arg6: memref<4x16x144xbf16, #tpu.memory_space<vmem>>, %arg7: memref<1x16x256xf32, #tpu.memory_space<vmem>>) attributes {dimension_semantics = [#tpu.dimension_semantics<parallel>, #tpu.dimension_semantics<parallel>], iteration_bounds = array<i64: 2, 1>, scalar_prefetch = 0 : i64, scratch_operands = 0 : i64, tpu.core_type = #tpu.core_type<tc>, window_params = [{transform_indices = @transform_0, window_bounds = array<i64: 2, 4>}, {transform_indices = @transform_1, window_bounds = array<i64: 1, 1, 144>}, {transform_indices = @transform_2, window_bounds = array<i64: 1, 16, 1>}, {transform_indices = @transform_3, window_bounds = array<i64: 1, 144, 256>}, {pipeline_mode = #tpu.pipeline_mode<synchronous>, transform_indices = @transform_4, window_bounds = array<i64: 4, 16, 144>}, {transform_indices = @transform_5, window_bounds = array<i64: 1, 16, 256>}]} {
    %c0 = arith.constant 0 : index
    %c0_0 = arith.constant 0 : index
    %c0_1 = arith.constant 0 : index
    %0 = vector.load %arg6[%c0, %c0_0, %c0_1] : memref<4x16x144xbf16, #tpu.memory_space<vmem>>, vector<1x16x144xbf16>
    %1 = vector.shape_cast %0 : vector<1x16x144xbf16> to vector<16x144xbf16>
    %2 = arith.extf %1 : vector<16x144xbf16> to vector<16x144xf32>
    %3 = arith.index_cast %arg0 : i32 to index
    %c0_2 = arith.constant 0 : index
    %4 = memref.load %arg2[%3, %c0_2] : memref<2x4xf32, #tpu.memory_space<smem>>
    %5 = vector.broadcast %4 : f32 to vector<16x144xf32>
    %6 = arith.mulf %2, %5 : vector<16x144xf32>
    %c1 = arith.constant 1 : index
    %c0_3 = arith.constant 0 : index
    %c0_4 = arith.constant 0 : index
    %7 = vector.load %arg6[%c1, %c0_3, %c0_4] : memref<4x16x144xbf16, #tpu.memory_space<vmem>>, vector<1x16x144xbf16>
    %8 = vector.shape_cast %7 : vector<1x16x144xbf16> to vector<16x144xbf16>
    %9 = arith.extf %8 : vector<16x144xbf16> to vector<16x144xf32>
    %10 = arith.index_cast %arg0 : i32 to index
    %c1_5 = arith.constant 1 : index
    %11 = memref.load %arg2[%10, %c1_5] : memref<2x4xf32, #tpu.memory_space<smem>>
    %12 = vector.broadcast %11 : f32 to vector<16x144xf32>
    %13 = arith.mulf %9, %12 : vector<16x144xf32>
    %14 = arith.addf %6, %13 : vector<16x144xf32>
    %c2 = arith.constant 2 : index
    %c0_6 = arith.constant 0 : index
    %c0_7 = arith.constant 0 : index
    %15 = vector.load %arg6[%c2, %c0_6, %c0_7] : memref<4x16x144xbf16, #tpu.memory_space<vmem>>, vector<1x16x144xbf16>
    %16 = vector.shape_cast %15 : vector<1x16x144xbf16> to vector<16x144xbf16>
    %17 = arith.extf %16 : vector<16x144xbf16> to vector<16x144xf32>
    %18 = arith.index_cast %arg0 : i32 to index
    %c2_8 = arith.constant 2 : index
    %19 = memref.load %arg2[%18, %c2_8] : memref<2x4xf32, #tpu.memory_space<smem>>
    %20 = vector.broadcast %19 : f32 to vector<16x144xf32>
    %21 = arith.mulf %17, %20 : vector<16x144xf32>
    %22 = arith.addf %14, %21 : vector<16x144xf32>
    %c3 = arith.constant 3 : index
    %c0_9 = arith.constant 0 : index
    %c0_10 = arith.constant 0 : index
    %23 = vector.load %arg6[%c3, %c0_9, %c0_10] : memref<4x16x144xbf16, #tpu.memory_space<vmem>>, vector<1x16x144xbf16>
    %24 = vector.shape_cast %23 : vector<1x16x144xbf16> to vector<16x144xbf16>
    %25 = arith.extf %24 : vector<16x144xbf16> to vector<16x144xf32>
    %26 = arith.index_cast %arg0 : i32 to index
    %c3_11 = arith.constant 3 : index
    %27 = memref.load %arg2[%26, %c3_11] : memref<2x4xf32, #tpu.memory_space<smem>>
    %28 = vector.broadcast %27 : f32 to vector<16x144xf32>
    %29 = arith.mulf %25, %28 : vector<16x144xf32>
    %30 = arith.addf %22, %29 : vector<16x144xf32>
    %c0_12 = arith.constant 0 : index
    %c0_13 = arith.constant 0 : index
    %c0_14 = arith.constant 0 : index
    %31 = vector.load %arg3[%c0_12, %c0_13, %c0_14] : memref<1x1x144xf32, #tpu.memory_space<vmem>>, vector<1x1x144xf32>
    %32 = vector.shape_cast %31 : vector<1x1x144xf32> to vector<1x144xf32>
    %33 = vector.broadcast %32 : vector<1x144xf32> to vector<16x144xf32>
    %34 = arith.mulf %30, %33 : vector<16x144xf32>
    %c0_15 = arith.constant 0 : index
    %c0_16 = arith.constant 0 : index
    %c0_17 = arith.constant 0 : index
    %35 = vector.load %arg4[%c0_15, %c0_16, %c0_17] : memref<1x16x1xf32, #tpu.memory_space<vmem>>, vector<1x16x1xf32>
    %36 = vector.shape_cast %35 : vector<1x16x1xf32> to vector<16x1xf32>
    %37 = vector.broadcast %36 : vector<16x1xf32> to vector<16x144xf32>
    %38 = arith.mulf %34, %37 : vector<16x144xf32>
    %39 = arith.truncf %38 : vector<16x144xf32> to vector<16x144xbf16>
    %c0_18 = arith.constant 0 : index
    %c0_19 = arith.constant 0 : index
    %c0_20 = arith.constant 0 : index
    %40 = vector.load %arg5[%c0_18, %c0_19, %c0_20] : memref<1x144x256xbf16, #tpu.memory_space<vmem>>, vector<1x144x256xbf16>
    %41 = vector.shape_cast %40 : vector<1x144x256xbf16> to vector<144x256xbf16>
    %cst = arith.constant dense<0.000000e+00> : vector<16x256xf32>
    %42 = tpu.matmul %39, %41, %cst {dimension_numbers = #tpu.dot_dimension_numbers<[1], [0], [0], [1], [0, 0, 1, 1], [], []>} : vector<16x144xbf16>, vector<144x256xbf16>, vector<16x256xf32> -> vector<16x256xf32>
    %c0_21 = arith.constant 0 : index
    %c0_22 = arith.constant 0 : index
    %c0_23 = arith.constant 0 : index
    %43 = vector.load %arg7[%c0_21, %c0_22, %c0_23] : memref<1x16x256xf32, #tpu.memory_space<vmem>>, vector<1x16x256xf32>
    %44 = vector.shape_cast %43 : vector<1x16x256xf32> to vector<16x256xf32>
    %45 = vector.shape_cast %42 : vector<16x256xf32> to vector<1x16x256xf32>
    tpu.vector_store %arg7[%c0_21, %c0_22, %c0_23], %45 {strides = array<i32>} : memref<1x16x256xf32, #tpu.memory_space<vmem>>, vector<1x16x256xf32>,
    return
  }
  func.func @transform_0(%arg0: i32, %arg1: i32) -> (i32, i32) {
    %c0_i32 = arith.constant 0 : i32
    %c0_i32_0 = arith.constant 0 : i32
    %c0_i32_1 = arith.constant 0 : i32
    return %c0_i32, %c0_i32_0 : i32, i32
  }
  func.func @transform_1(%arg0: i32, %arg1: i32) -> (i32, i32, i32) {
    %c0_i32 = arith.constant 0 : i32
    %c0_i32_0 = arith.constant 0 : i32
    %c0_i32_1 = arith.constant 0 : i32
    return %arg0, %c0_i32, %c0_i32_0 : i32, i32, i32
  }
  func.func @transform_2(%arg0: i32, %arg1: i32) -> (i32, i32, i32) {
    %c0_i32 = arith.constant 0 : i32
    %c0_i32_0 = arith.constant 0 : i32
    %c0_i32_1 = arith.constant 0 : i32
    return %arg0, %c0_i32, %c0_i32_0 : i32, i32, i32
  }
  func.func @transform_3(%arg0: i32, %arg1: i32) -> (i32, i32, i32) {
    %c0_i32 = arith.constant 0 : i32
    %c0_i32_0 = arith.constant 0 : i32
    return %arg0, %c0_i32, %arg1 : i32, i32, i32
  }
  func.func @transform_4(%arg0: i32, %arg1: i32) -> (i32, i32, i32) {
    %c0_i32 = arith.constant 0 : i32
    %c0_i32_0 = arith.constant 0 : i32
    %c0_i32_1 = arith.constant 0 : i32
    %c0_i32_2 = arith.constant 0 : i32
    return %c0_i32, %c0_i32_0, %c0_i32_1 : i32, i32, i32
  }
  func.func @transform_5(%arg0: i32, %arg1: i32) -> (i32, i32, i32) {
    %c0_i32 = arith.constant 0 : i32
    %c0_i32_0 = arith.constant 0 : i32
    return %arg0, %c0_i32, %arg1 : i32, i32, i32
  }
}

</mosaic_0001>

<bundles_post_ra>
// kernel: odconv_forward.1
= control target key start
LH: loop header
LB: loop body
LE: loop exit
PB: predicated region body
PF: predicated region fallthrough
CT: control target
= control target key end

     0   :  { %10 = vsyncpa [#allocation3], 0  ;;  %s882_s18 = smov 0   ;;  %s884_s19 = smov 0   ;;  %s1001_s0 = inlined_call_operand.vmem [shape: f32[2,4], index: 0, kind: input, shape index: {}]   ;;  %s1002_s1 = inlined_call_operand.vmem [shape: f32[2,1,144], index: 1, kind: input, shape index: {}]   ;;  %s1003_s2 = inlined_call_operand.vmem [shape: f32[2,16,1], index: 2, kind: input, shape index: {}]   ;;  %s1004_s3 = inlined_call_operand.vmem [shape: bf16[2,144,256], index: 3, kind: input, shape index: {}]   ;;  %s1005_s4 = inlined_call_operand.vmem [shape: bf16[4,16,144], index: 4, kind: input, shape index: {}]   ;;  %s1006_s5 = inlined_call_operand.vmem [shape: f32[2,16,256], index: 5, kind: output, shape index: {}]  }
   0x1   :  { %s886_s20 = smov 0  }
   0x2 LB: > { %s699_s21 = sadd.s32 4294967295, %s848_s20   ;;  %s28_s22 = sadd.s32 1, %s844_s19  ;;  %s848_s20 = sphi %s886_s20, %s16_s20   ;;  %s844_s19 = sphi %s884_s19, %s1010_s19   ;;  %s840_s18 = sphi %s882_s18, %s1009_s18  }
   0x3   : > { %p30_p0 = scmp.ge.s32.totalorder %s28_s22, 2  ;;  %p701_p1 = scmp.ge.s32.totalorder %s848_s20, 1 }
   0x4   : > { %p183_p2 = scmp.lt.s32.totalorder %s848_s20, 3  ;;  %p907_p4 = scmp.eq.s32.totalorder %s699_s21, 0 }
   0x5   : > { %s1012_s22 = smov (%p30_p0, %s28_s22), 0  ;;  %s196_s27 = sshll.u32 %s1001_s0, 4  ;;  %s197_s27 = int_to_ptr.vmem [resolvable:$true] %s196_s27 }
   0x6   : > { %p903_p3 = pnand %p701_p1, %p183_p2  ;;  %s807_s28 = scalar_lea.vmem %s197_s27, 32 }
   0x7   : > { %p808_p7 = scmp.ne.s32.totalorder %s197_s27, %s807_s28  ;;  %p815_p11 = scmp.lt.s32.totalorder %s197_s27, %s197_s27 }
   0x8   : > { %p747_p5 = pneg %p903_p3  ;;  %p816_p12 = scmp.lt.s32.totalorder %s807_s28, %s807_s28 }
   0xa   : > { %p748_p6 = pnand %p907_p4, %p747_p5  ;;  %p817_p13 = por %p816_p12, %p815_p11 }
   0xc   : > { %p809_p8 = pneg %p748_p6 }
   0xe   : > { %p810_p9 = pnand %p809_p8, %p808_p7 }
  0x10   : > { %p811_p10 = pneg %p810_p9 }
  0x12   : > { %p818_p0 = pnand %p817_p13, %p811_p10 }
  0x14   : > { %821 = shalt.err (!%p818_p0)
}
  0x15   : > { %s850_s29 = smov [#allocation2]   ;;  %240 = sbr.rel (%p903_p3) target bundleno = 391 (0x187), region = 40 }
  0x16   : > { %750 = dma.vmem_to_smem (!%p748_p6), %s197_s27, 32, %s850_s29, [#allocation3]  }
  0x1c   : > { %835 = dma.done.wait (%p907_p4), [#allocation3], 32  }
  0x1d   : > { %837 = vsyncadd (%p907_p4), [#allocation3], 4294967264 }
  0x1e   : > { %246 = sfence }
  0x1f   : > { %p286_p1 = scmp.lt.s32.totalorder %s840_s18, 1  ;;  %v851_v0 = vmov 0   ;;  %s712_s14 = sshll.u32 %s840_s18, 7  ;;  %v316_v21 = vld [vmem:[%s1005_s4] sm:$0xff]  ;;  %v713_v22 = vld [vmem:[%s1005_s4 + $0x10] sm:$0xff]  ;;  %v317_v23 = vld [vmem:[%s1005_s4 + $0x8] sm:$0xff]  ;;  %v385_v38 = vlaneseq }
  0x20   : > { %779 = vset.pattern.permute.xlu0 %v851_v0  ;;  %s336_s15 = sadd.s32 1, %s712_s14  ;;  %s323_s16 = sld [smem:[#allocation2 + %s712_s14]]  ;;  %v714_v24 = vld [vmem:[%s1005_s4 + $0x18] sm:$0xff]  ;;  %v318_v25 = vunpack.c.l.bf16 %v316_v21  ;;  %v319_v26 = vunpack.c.h.bf16 %v316_v21  ;;  %v332_v27 = vunpack.c.l.bf16 %v713_v22  ;;  %v715_v28 = vld [vmem:[%s1005_s4 + $0x20] sm:$0xff]  ;;  %v333_v30 = vunpack.c.h.bf16 %v713_v22  ;;  %v716_v33 = vld [vmem:[%s1005_s4 + $0x28] sm:$0xff] }
  0x21   : > { %s926_s30 = scalar_select %p286_p1, %s840_s18, 1  ;;  %v320_v32 = vunpack.c.l.bf16 %v317_v23  ;;  %v321_v34 = vunpack.c.h.bf16 %v317_v23  ;;  %v334_v35 = vunpack.c.l.bf16 %v714_v24  ;;  %v335_v36 = vunpack.c.h.bf16 %v714_v24  ;;  %v717_v42 = vld [vmem:[%s1005_s4 + $0x30] sm:$0xff]  ;;  %v718_v48 = vld [vmem:[%s1005_s4 + $0x38] sm:$0xff] }
  0x22   : > { %s337_s17 = sld [smem:[#allocation2 + %s336_s15]]  ;;  %s354_s21 = sadd.s32 2, %s712_s14  ;;  %v350_v37 = vunpack.c.l.bf16 %v715_v28  ;;  %v351_v41 = vunpack.c.h.bf16 %v715_v28  ;;  %v352_v43 = vunpack.c.l.bf16 %v716_v33  ;;  %v353_v47 = vunpack.c.h.bf16 %v716_v33 }
  0x23   : > { %s740_s6 = sshll.u32 %s926_s30, 4  ;;  %s742_s7 = smul.u32 144, %s926_s30  ;;  %v368_v53 = vunpack.c.l.bf16 %v717_v42  ;;  %v369_v54 = vunpack.c.h.bf16 %v717_v42  ;;  %v386_v56 = vshrl.u32 %v385_v38, 7  ;;  %v370_v57 = vunpack.c.l.bf16 %v718_v48 }
  0x24   : > { %s294_s10 = scalar_lea.vmem %s1003_s2, %s740_s6  ;;  %s355_s27 = sld [smem:[#allocation2 + %s354_s21]]  ;;  %v371_v58 = vunpack.c.h.bf16 %v718_v48  ;;  %vm525_vm0 = vcmask 130048  }
  0x25   : > { %s936_s13 = scalar_lea.vmem %s1004_s3, %s742_s7  ;;  %v399_v1 = vld [vmem:[%s294_s10] sm:$0xff]  ;;  %v400_v2 = vld [vmem:[%s294_s10 + $0x8] sm:$0xff]  ;;  %s372_s28 = sadd.s32 3, %s712_s14 }
  0x26   : > { %403 = vperm.xlu0 %779, %v399_v1   ;;  %v780_v3 = vld [vmem:[%s936_s13 + $0x4] ss:$8 sps:$4 sm:$0xff]   ;;  %v782_v4 = vld [vmem:[%s936_s13] ss:$8 sps:$4 sm:$0xff]   ;;  %v783_v5 = vld [vmem:[%s936_s13 + $0x14] ss:$8 sps:$4 sm:$0xff]   ;;  %v324_v29 = vstv %s323_s16 }
  0x27   : > { %529 = vmatprep.subr.bf16.mxu0 %v780_v3  ;;  %v785_v6 = vld [vmem:[%s936_s13 + $0x10] ss:$8 sps:$4 sm:$0xff]   ;;  %v786_v7 = vld [vmem:[%s936_s13 + $0x24] ss:$8 sps:$4 sm:$0xff]   ;;  %v788_v8 = vld [vmem:[%s936_s13 + $0x20] ss:$8 sps:$4 sm:$0xff]   ;;  %v325_v39 = vmul.f32 %v324_v29, %v318_v25  ;;  %v326_v44 = vmul.f32 %v324_v29, %v319_v26  ;;  %v327_v46 = vmul.f32 %v324_v29, %v320_v32  ;;  %v328_v50 = vmul.f32 %v324_v29, %v321_v34 }
  0x28   : > { %530 = vmatpush1.bf16.msra.mxu0 %v782_v4  ;;  %v789_v9 = vld [vmem:[%s936_s13 + $0x34] ss:$8 sps:$4 sm:$0xff]   ;;  %v791_v10 = vld [vmem:[%s936_s13 + $0x30] ss:$8 sps:$4 sm:$0xff]   ;;  %v792_v11 = vld [vmem:[%s936_s13 + $0x44] ss:$8 sps:$4 sm:$0xff]   ;;  %v338_v31 = vstv %s337_s17 }
  0x29   : > { %531 = vmatprep.subr.bf16.mxu0 %v783_v5  ;;  %v794_v12 = vld [vmem:[%s936_s13 + $0x40] ss:$8 sps:$4 sm:$0xff]   ;;  %v795_v13 = vld [vmem:[%s936_s13 + $0x54] ss:$8 sps:$4 sm:$0xff]   ;;  %v797_v14 = vld [vmem:[%s936_s13 + $0x50] ss:$8 sps:$4 sm:$0xff]   ;;  %v339_v40 = vmul.f32 %v338_v31, %v332_v27  ;;  %v340_v45 = vmul.f32 %v338_v31, %v333_v30  ;;  %v341_v51 = vmul.f32 %v338_v31, %v334_v35  ;;  %v342_v52 = vmul.f32 %v338_v31, %v335_v36 }
  0x2a   : > { %408 = vperm.xlu0 %779, %v400_v2   ;;  %v798_v15 = vld [vmem:[%s936_s13 + $0x64] ss:$8 sps:$4 sm:$0xff]   ;;  %v800_v16 = vld [vmem:[%s936_s13 + $0x60] ss:$8 sps:$4 sm:$0xff]   ;;  %v801_v17 = vld [vmem:[%s936_s13 + $0x74] ss:$8 sps:$4 sm:$0xff]   ;;  %v356_v49 = vstv %s355_s27 }
  0x2b   : > { %v803_v18 = vld [vmem:[%s936_s13 + $0x70] ss:$8 sps:$4 sm:$0xff]   ;;  %v804_v19 = vld [vmem:[%s936_s13 + $0x84] ss:$8 sps:$4 sm:$0xff]   ;;  %v806_v20 = vld [vmem:[%s936_s13 + $0x80] ss:$8 sps:$4 sm:$0xff]   ;;  %v343_v55 = vadd.f32 %v339_v40, %v325_v39  ;;  %v344_v59 = vadd.f32 %v340_v45, %v326_v44  ;;  %v357_v60 = vmul.f32 %v356_v49, %v350_v37  ;;  %v358_v61 = vmul.f32 %v356_v49, %v351_v41 }
  0x2c   : > { %532 = vmatpush1.bf16.msra.mxu0 %v785_v6  ;;  %s972_s10 = sld [smem:[#allocation2 + %s372_s28]]  ;;  %s706_s17 = sshll.u32 %s926_s30, 1  ;;  %v345_v63 = vadd.f32 %v341_v51, %v327_v46  ;;  %v346_v0 = vadd.f32 %v342_v52, %v328_v50  ;;  %v359_v1 = vmul.f32 %v356_v49, %v352_v43  ;;  %v360_v2 = vmul.f32 %v356_v49, %v353_v47 }
  0x2d   : > { %533 = vmatprep.subr.bf16.mxu0 %v786_v7  ;;  %v387_v3 = vsub.s32 0, %v386_v56  ;;  %v391_v4 = vsub.s32 1, %v386_v56  ;;  %s289_s24 = scalar_lea.vmem %s1002_s1, %s706_s17  ;;  %v361_v5 = vadd.f32 %v357_v60, %v343_v55  ;;  %v362_v6 = vadd.f32 %v358_v61, %v344_v59  ;;  %s741_s25 = sshll.u32 %s926_s30, 5 }
  0x2e   : > { %s313_s28 = scalar_lea.vmem %s1006_s5, %s741_s25 }
  0x30   : > { %534 = vmatpush1.bf16.msra.mxu0 %v788_v8 }
  0x31   : > { %535 = vmatprep.subr.bf16.mxu0 %v789_v9  ;;  %v363_v9 = vadd.f32 %v359_v1, %v345_v63 }
  0x32   : > { %v374_v62 = vstv %s972_s10 }
  0x33   : > { %v375_v7 = vmul.f32 %v374_v62, %v368_v53  ;;  %v376_v8 = vmul.f32 %v374_v62, %v369_v54 }
  0x34   : > { %536 = vmatpush1.bf16.msra.mxu0 %v791_v10  ;;  %v364_v10 = vadd.f32 %v360_v2, %v346_v0 }
  0x35   : > { %537 = vmatprep.subr.bf16.mxu0 %v792_v11  ;;  %v377_v11 = vmul.f32 %v374_v62, %v370_v57 }
  0x38   : > { %538 = vmatpush1.bf16.msra.mxu0 %v794_v12  ;;  %v378_v12 = vmul.f32 %v374_v62, %v371_v58 }
  0x39   : > { %539 = vmatprep.subr.bf16.mxu0 %v795_v13  ;;  %v383_v13 = vld [vmem:[%s289_s24] sm:$0x3] }
  0x3c   : > { %540 = vmatpush1.bf16.msra.mxu0 %v797_v14  ;;  %v379_v14 = vadd.f32 %v375_v7, %v361_v5 }
  0x3d   : > { %541 = vmatprep.subr.bf16.mxu0 %v798_v15  ;;  %v380_v15 = vadd.f32 %v376_v8, %v362_v6 }
  0x40   : > { %542 = vmatpush1.bf16.msra.mxu0 %v800_v16  ;;  %v388_v16 = vrot.slane %v383_v13, %v387_v3 }
  0x41   : > { %543 = vmatprep.subr.bf16.mxu0 %v801_v17  ;;  %v392_v17 = vrot.slane %v383_v13, %v391_v4 }
  0x42   : > { %v395_v21 = vmul.f32 %v388_v16, %v379_v14 }
  0x43   : > { %v396_v22 = vmul.f32 %v392_v17, %v380_v15 }
  0x44   : > { %544 = vmatpush1.bf16.msra.mxu0 %v803_v18  ;;  %v381_v18 = vadd.f32 %v377_v11, %v363_v9 }
  0x45   : > { %545 = vmatprep.subr.bf16.mxu0 %v804_v19  ;;  %v382_v19 = vadd.f32 %v378_v12, %v364_v10 }
  0x46   : > { %v397_v23 = vmul.f32 %v388_v16, %v381_v18 }
  0x47   : > { %v398_v24 = vmul.f32 %v392_v17, %v382_v19 }
  0x48   : > { %546 = vmatpush1.bf16.msra.mxu0 %v806_v20 }
  0xa5   : > { %v404_v20 = vpop.permute.xlu0 %403 }
  0xa6   : > { %v411_v26 = vmul.f32 %v404_v20, %v395_v21  ;;  %v412_v27 = vmul.f32 %v404_v20, %v396_v22 }
  0xa9   : > { %v409_v25 = vpop.permute.xlu0 %408 }
  0xaa   : > { %v413_v28 = vmul.f32 %v409_v25, %v397_v23  ;;  %v414_v29 = vmul.f32 %v409_v25, %v398_v24 }
  0xac   : > { %v415_v30 = vpack.c.bf16 %v413_v28, %v411_v26  ;;  %v416_v31 = vpack.c.bf16 %v414_v29, %v412_v27 }
  0xae   : > { %737 = vmatprep.mubr.msk.bf16.mxu0 %vm525_vm0, %v416_v31 }
  0xaf   : > { %562 = vmatmul.mubr.bf16.vlgmr.msra.gmra.mrb[0].mxu0 %v415_v30 }
 0x182   : > { %v563_v32 = vpop.f32.mrb[0].mxu0 }
 0x183   : > { %572 = vst [vmem:[%s313_s28] sm:$0xff] %v563_v32  ;;  %v565_v33 = vpop.f32.mrb[1].mxu0 }
 0x184   : > { %573 = vst [vmem:[%s313_s28 + $0x8] sm:$0xff] %v565_v33  ;;  %v567_v34 = vpop.f32.mrb[2].mxu0 }
 0x185   : > { %574 = vst [vmem:[%s313_s28 + $0x10] sm:$0xff] %v567_v34  ;;  %v569_v35 = vpop.f32.mrb[3].mxu0 }
 0x186   : > { %575 = vst [vmem:[%s313_s28 + $0x18] sm:$0xff] %v569_v35 }
 0x187 PF: > { %s16_s20 = sadd.s32 1, %s848_s20   ;;  %s1009_s18 = smov %s844_s19 }
 0x188   : > { %p13_p2 = scmp.ge.s32.totalorder %s16_s20, 4   ;;  %s1010_s19 = smov %s1012_s22 }
 0x18a   :  { %15 = sbr.rel (!%p13_p2) target bundleno = 2 (0x2), region = 84 }
 0x191   :  { %606 = vsyncpa [#allocation3], 1 }
 0x192   :  { %608 = vsyncpa [#allocation3 + $0x1], 1 }

</bundles_post_ra>
